<compile_context>
chip_gen: v7x
topology: tpu7x:2x2x1
jax: 0.10.0
libtpu: 0.0.40
codegen_flags: <defaults>
</compile_context>

<pallas_src>
import jax
import jax.numpy as jnp
from jax import lax
from jax.experimental import pallas as pl
from jax.experimental.pallas import tpu as pltpu

# ---- model hyper-parameters (small demo sizes, same structure as the module) ----
AMINO_ACIDS = 20          # len('ACDEFGHIKLMNPQRSTVWY')
SEQ_LEN = 64              # original module uses 1000; kept small for the demo
HIDDEN = 20               # hidden_dim in the module
IN_DIM = SEQ_LEN * AMINO_ACIDS
BATCH = 64


def _disc_kernel(x_ref, w1t_ref, p_ref, o_ref):
    # x_ref  : (bm, d)   f32   batch tile x full flattened row
    # w1t_ref: (H, d)    bf16  W1 transposed (resident; constant block index)
    # p_ref  : (3, H)    f32   row0 = b1, row1 = w2 (as a row), row2 = [b2, 0, ...]
    # o_ref  : (bm, 1)   f32
    x_bf = x_ref[...].astype(jnp.bfloat16)          # in-kernel cast rides slack VPU slots
    # Linear 1 on the MXU: contract the d axis of x with the d axis of W1^T, f32 acc.
    h = lax.dot_general(x_bf, w1t_ref[...],
                        dimension_numbers=(((1,), (1,)), ((), ())),
                        preferred_element_type=jnp.float32)
    h = h + p_ref[0:1, :]                           # bias b1 (f32)
    h = jnp.maximum(h, 0.2 * h)                     # LeakyReLU(0.2), single VPU op
    # Linear 2 (hidden -> 1) as VPU broadcast-mul + 20-lane reduce (+ bias b2).
    logit = jnp.sum(h * p_ref[1:2, :], axis=-1, keepdims=True) + p_ref[2:3, 0:1]
    # Sigmoid: exp + approximate reciprocal both land on the EUP slot.
    o_ref[...] = pl.reciprocal(1.0 + jnp.exp(-logit), approx=True)


def _num_tensorcores():
    """Best-effort TensorCore count (v7x reports 2); safe fallback to 1."""
    try:
        return max(1, int(getattr(jax.devices()[0], "num_cores", 1)))
    except Exception:
        return 1


def _pick_bm(batch, d, n_cores):
    """Rows per grid step.
    Single-TC (v5e/v6e): one big tile — extra grid steps are pure overhead.
    Megacore (v7x): at least `n_cores` parallel batch tiles.
    Always cap so the double-buffered full-row f32 x tile stays well under 64 MiB."""
    bm = batch if n_cores <= 1 else pl.cdiv(batch, n_cores)
    bm = min(bm, 256)
    budget = 40 * 1024 * 1024                      # headroom under v7x's 64 MiB / TC
    max_rows = max(8, budget // (2 * d * 4))       # 2 buffers x f32 full-row tiles
    bm = min(bm, max_rows)
    if bm >= batch:
        return batch                               # block == full dim is always legal
    return max(8, (bm // 8) * 8)                   # tiled blocks need sublane multiples


def _vmem_limit_bytes(bm, d):
    """Just enough scoped VMEM for 2x x-tile + 2x W1^T tile, clamped to [32, 64] MiB."""
    lane_d = 128 * pl.cdiv(d, 128)
    needed = 2 * bm * lane_d * 4 + 2 * 32 * lane_d * 2 + (2 << 20)
    return int(min(max(needed, 32 * 1024 * 1024), 64 * 1024 * 1024))


@jax.jit
def discriminator_forward(seq, w1, b1, w2, b2):
    """seq: (B, S, A) float32 -> validity: (B, 1) float32."""
    B = seq.shape[0]
    flat = seq.reshape(B, -1)                       # == seq.view(B, -1); stays f32
    d = flat.shape[1]
    hidden = w1.shape[1]

    n_cores = _num_tensorcores()
    bm = _pick_bm(B, d, n_cores)
    b_pad = bm * pl.cdiv(B, bm)
    if b_pad != B:
        flat = jnp.pad(flat, ((0, b_pad - B), (0, 0)))   # padded rows sliced off below

    # W1 transposed + bf16 (small: ~2 B/elt); MXU accumulates in f32.
    w1t_bf = w1.T.astype(jnp.bfloat16)                   # (H, d)
    # Fold the tiny params into one (3, H) block.
    params = jnp.concatenate(
        [b1.reshape(1, hidden).astype(jnp.float32),
         w2.reshape(1, hidden).astype(jnp.float32),
         jnp.pad(b2.reshape(1, 1).astype(jnp.float32), ((0, 0), (0, hidden - 1)))],
        axis=0)

    cost = pl.CostEstimate(
        flops=2 * b_pad * d * hidden + 4 * b_pad * hidden,
        transcendentals=b_pad,
        bytes_accessed=b_pad * d * 4 + hidden * d * 2 + 3 * hidden * 4 + b_pad * 4)

    out = pl.pallas_call(
        _disc_kernel,
        out_shape=jax.ShapeDtypeStruct((b_pad, 1), jnp.float32),
        grid_spec=pltpu.PrefetchScalarGridSpec(
            num_scalar_prefetch=0,
            grid=(b_pad // bm,),                                  # batch tiles only
            in_specs=[
                pl.BlockSpec((bm, d), lambda i: (i, 0)),          # x tile, full row
                pl.BlockSpec((hidden, d), lambda i: (0, 0)),      # W1^T, resident
                pl.BlockSpec((3, hidden), lambda i: (0, 0)),      # b1 / w2 / b2
            ],
            out_specs=pl.BlockSpec((bm, 1), lambda i: (i, 0)),
        ),
        compiler_params=pltpu.CompilerParams(
            dimension_semantics=("parallel",),
            vmem_limit_bytes=_vmem_limit_bytes(bm, d),
        ),
        cost_estimate=cost,
    )(flat, w1t_bf, params)
    return out[:B]


def init_params(key):
    """Deterministic parameter init (shapes match the nn.Linear layers, stored as (in, out))."""
    k1, k2, k3, k4 = jax.random.split(key, 4)
    s1 = 1.0 / jnp.sqrt(IN_DIM)
    s2 = 1.0 / jnp.sqrt(HIDDEN)
    w1 = jax.random.uniform(k1, (IN_DIM, HIDDEN), jnp.float32, -s1, s1)
    b1 = jax.random.uniform(k2, (1, HIDDEN), jnp.float32, -s1, s1)
    w2 = jax.random.uniform(k3, (HIDDEN, 1), jnp.float32, -s2, s2)
    b2 = jax.random.uniform(k4, (1, 1), jnp.float32, -s2, s2)
    return w1, b1, w2, b2


def _reference(seq, w1, b1, w2, b2):
    flat = seq.reshape(seq.shape[0], -1)
    h = flat @ w1 + b1
    h = jnp.where(h > 0, h, 0.2 * h)
    return jax.nn.sigmoid(h @ w2 + b2)


if __name__ == "__main__":
    key = jax.random.PRNGKey(0)
    kp, kx = jax.random.split(key)
    w1, b1, w2, b2 = init_params(kp)

    # one-hot protein sequences, shape (B, S, A)
    idx = jax.random.randint(kx, (BATCH, SEQ_LEN), 0, AMINO_ACIDS)
    seq = jax.nn.one_hot(idx, AMINO_ACIDS, dtype=jnp.float32)

    out = discriminator_forward(seq, w1, b1, w2, b2)
    out = jax.block_until_ready(out)

    ref = _reference(seq, w1, b1, w2, b2)
    assert out.shape == (BATCH, 1)
    # tolerance loosened vs pure-f32: x/W1 hit the MXU as bf16 and the sigmoid
    # reciprocal is the EUP approximate one (both deliberate perf choices).
    assert jnp.allclose(out, ref, atol=5e-3, rtol=5e-3), float(jnp.max(jnp.abs(out - ref)))

    print("KERNEL_OK")
</pallas_src>

<mosaic_0001>
module attributes {stable_mosaic.version = 11 : i64} {
  func.func @_disc_kernel(%arg0: i32, %arg1: memref<64x1280xf32, #tpu.memory_space<vmem>>, %arg2: memref<20x1280xbf16, #tpu.memory_space<vmem>>, %arg3: memref<3x20xf32, #tpu.memory_space<vmem>>, %arg4: memref<64x1xf32, #tpu.memory_space<vmem>>) attributes {dimension_semantics = [#tpu.dimension_semantics<parallel>], iteration_bounds = array<i64: 1>, scalar_prefetch = 0 : i64, scratch_operands = 0 : i64, tpu.core_type = #tpu.core_type<tc>, window_params = [{transform_indices = @transform_0, window_bounds = array<i64: 64, 1280>}, {pipeline_mode = #tpu.pipeline_mode<synchronous>, transform_indices = @transform_1, window_bounds = array<i64: 20, 1280>}, {pipeline_mode = #tpu.pipeline_mode<synchronous>, transform_indices = @transform_2, window_bounds = array<i64: 3, 20>}, {transform_indices = @transform_3, window_bounds = array<i64: 64, 1>}]} {
    %c0 = arith.constant 0 : index
    %c0_0 = arith.constant 0 : index
    %0 = vector.load %arg1[%c0, %c0_0] : memref<64x1280xf32, #tpu.memory_space<vmem>>, vector<64x1280xf32>
    %1 = arith.truncf %0 : vector<64x1280xf32> to vector<64x1280xbf16>
    %c0_1 = arith.constant 0 : index
    %c0_2 = arith.constant 0 : index
    %2 = vector.load %arg2[%c0_1, %c0_2] : memref<20x1280xbf16, #tpu.memory_space<vmem>>, vector<20x1280xbf16>
    %cst = arith.constant dense<0.000000e+00> : vector<64x20xf32>
    %3 = tpu.matmul %1, %2, %cst {dimension_numbers = #tpu.dot_dimension_numbers<[1], [1], [0], [0], [0, 0, 1, 0], [], []>} : vector<64x1280xbf16>, vector<20x1280xbf16>, vector<64x20xf32> -> vector<64x20xf32>
    %c0_3 = arith.constant 0 : index
    %c0_4 = arith.constant 0 : index
    %4 = vector.load %arg3[%c0_3, %c0_4] : memref<3x20xf32, #tpu.memory_space<vmem>>, vector<1x20xf32>
    %5 = vector.broadcast %4 : vector<1x20xf32> to vector<64x20xf32>
    %6 = arith.addf %3, %5 : vector<64x20xf32>
    %cst_5 = arith.constant 2.000000e-01 : f32
    %7 = vector.broadcast %cst_5 : f32 to vector<64x20xf32>
    %8 = arith.mulf %7, %6 : vector<64x20xf32>
    %9 = arith.maximumf %6, %8 : vector<64x20xf32>
    %c1 = arith.constant 1 : index
    %c0_6 = arith.constant 0 : index
    %10 = vector.load %arg3[%c1, %c0_6] : memref<3x20xf32, #tpu.memory_space<vmem>>, vector<1x20xf32>
    %11 = vector.broadcast %10 : vector<1x20xf32> to vector<64x20xf32>
    %12 = arith.mulf %9, %11 : vector<64x20xf32>
    %cst_7 = arith.constant dense<0.000000e+00> : vector<64xf32>
    %13 = vector.multi_reduction <add>, %12, %cst_7 [1] : vector<64x20xf32> to vector<64xf32>
    %14 = vector.shape_cast %13 : vector<64xf32> to vector<64x1xf32>
    %c2 = arith.constant 2 : index
    %c0_8 = arith.constant 0 : index
    %15 = vector.load %arg3[%c2, %c0_8] : memref<3x20xf32, #tpu.memory_space<vmem>>, vector<1x1xf32>
    %16 = vector.broadcast %15 : vector<1x1xf32> to vector<64x1xf32>
    %17 = arith.addf %14, %16 : vector<64x1xf32>
    %cst_9 = arith.constant 0.000000e+00 : f32
    %18 = vector.broadcast %cst_9 : f32 to vector<64x1xf32>
    %19 = arith.subf %18, %17 : vector<64x1xf32>
    %20 = math.exp %19 : vector<64x1xf32>
    %cst_10 = arith.constant 1.000000e+00 : f32
    %21 = vector.broadcast %cst_10 : f32 to vector<64x1xf32>
    %22 = arith.addf %21, %20 : vector<64x1xf32>
    %23 = tpu.reciprocal %22 {approx = true} : vector<64x1xf32> -> vector<64x1xf32>
    %c0_11 = arith.constant 0 : index
    %c0_12 = arith.constant 0 : index
    %24 = vector.load %arg4[%c0_11, %c0_12] : memref<64x1xf32, #tpu.memory_space<vmem>>, vector<64x1xf32>
    tpu.vector_store %arg4[%c0_11, %c0_12], %23 {strides = array<i32>} : memref<64x1xf32, #tpu.memory_space<vmem>>, vector<64x1xf32>,
    return
  }
  func.func @transform_0(%arg0: i32) -> (i32, i32) {
    %c0_i32 = arith.constant 0 : i32
    %c0_i32_0 = arith.constant 0 : i32
    return %arg0, %c0_i32 : i32, i32
  }
  func.func @transform_1(%arg0: i32) -> (i32, i32) {
    %c0_i32 = arith.constant 0 : i32
    %c0_i32_0 = arith.constant 0 : i32
    %c0_i32_1 = arith.constant 0 : i32
    return %c0_i32, %c0_i32_0 : i32, i32
  }
  func.func @transform_2(%arg0: i32) -> (i32, i32) {
    %c0_i32 = arith.constant 0 : i32
    %c0_i32_0 = arith.constant 0 : i32
    %c0_i32_1 = arith.constant 0 : i32
    return %c0_i32, %c0_i32_0 : i32, i32
  }
  func.func @transform_3(%arg0: i32) -> (i32, i32) {
    %c0_i32 = arith.constant 0 : i32
    %c0_i32_0 = arith.constant 0 : i32
    return %arg0, %c0_i32 : i32, i32
  }
}

</mosaic_0001>

<bundles_post_ra>
// kernel: discriminator_forward.1
= control target key start
LH: loop header
LB: loop body
LE: loop exit
PB: predicated region body
PF: predicated region fallthrough
CT: control target
= control target key end

     0   :  { %vm594_vm0 = vcmask 162816   ;;  %vm672_vm1 = vcmask 7168   ;;  %s1223_s1 = inlined_call_operand.vmem [shape: bf16[20,1280], index: 1, kind: input, shape index: {}]   ;;  %s1224_s0 = inlined_call_operand.vmem [shape: f32[64,1280], index: 0, kind: input, shape index: {}]   ;;  %s1225_s2 = inlined_call_operand.vmem [shape: f32[3,20], index: 2, kind: input, shape index: {}]   ;;  %s1226_s3 = inlined_call_operand.vmem [shape: f32[64,1], index: 3, kind: output, shape index: {}]  }
   0x1   :  { %v776_v0 = vld [vmem:[%s1223_s1 + $0x4] ss:$40 sps:$4 sm:$0xff]   ;;  %v859_v1 = vld [vmem:[%s1223_s1 + $0x14] ss:$40 sps:$4 sm:$0xff]   ;;  %v780_v2 = vld [vmem:[%s1223_s1] ss:$40 sps:$4 sm:$0xff]  }
   0x2   :  { %240 = vmatprep.subr.bf16.mxu1 %v776_v0  ;;  %v867_v3 = vld [vmem:[%s1223_s1 + $0x10] ss:$40 sps:$4 sm:$0xff]   ;;  %370 = vmatprep.subr.bf16.mxu0 %v859_v1  ;;  %v147_v6 = vld [vmem:[%s1223_s1 + $0x60] sm:$0x33]  ;;  %v16_v7 = vld [vmem:[%s1224_s0 + $0x8] sm:$0xff] }
   0x3   :  { %v145_v4 = vld [vmem:[%s1223_s1 + $0x50] sm:$0x33]  ;;  %v26_v8 = vld [vmem:[%s1224_s0 + $0x58] sm:$0xff]  ;;  %241 = vmatpush1.bf16.xpose.msra.mxu1 %v780_v2  ;;  %371 = vmatpush1.bf16.xpose.msra.mxu0 %v867_v3  ;;  %v883_v9 = vcombine.high %v147_v6, %v147_v6  ;;  %v20_v11 = vld [vmem:[%s1224_s0 + $0x28] sm:$0xff]  ;;  %v892_v15 = vcombine.low %v147_v6, %v147_v6 }
   0x4   :  { %v697_v5 = vcombine.high %v145_v4, %v145_v4  ;;  %v96_v10 = vpack.c.bf16 %v26_v8, %v16_v7  ;;  %v30_v12 = vld [vmem:[%s1224_s0 + $0x78] sm:$0xff]  ;;  %v696_v14 = vcombine.low %v145_v4, %v145_v4  ;;  %v788_v16 = vld [vmem:[%s1223_s1 + $0xc] ss:$40 sps:$4 sm:$0xff]   ;;  %v15_v18 = vld [vmem:[%s1224_s0] sm:$0xff] }
   0x5   :  { %v100_v13 = vpack.c.bf16 %v30_v12, %v20_v11  ;;  %372 = vmatprep.subr.bf16.mxu0 %v883_v9  ;;  %v791_v17 = vld [vmem:[%s1223_s1 + $0x1c] ss:$40 sps:$4 sm:$0xff]   ;;  %v25_v19 = vld [vmem:[%s1224_s0 + $0x50] sm:$0xff]  ;;  %v36_v22 = vld [vmem:[%s1224_s0 + $0xa8] sm:$0xff] }
   0x6   :  { %242 = vmatprep.subr.bf16.mxu1 %v697_v5  ;;  %272 = vmatprep.mubr.bf16.mxu1 %v96_v10  ;;  %v19_v20 = vld [vmem:[%s1224_s0 + $0x20] sm:$0xff]  ;;  %v29_v21 = vld [vmem:[%s1224_s0 + $0x70] sm:$0xff]  ;;  %v46_v23 = vld [vmem:[%s1224_s0 + $0xf8] sm:$0xff]  ;;  %v95_v26 = vpack.c.bf16 %v25_v19, %v15_v18 }
   0x7   :  { %402 = vmatprep.mubr.bf16.mxu0 %v100_v13  ;;  %v40_v24 = vld [vmem:[%s1224_s0 + $0xc8] sm:$0xff]  ;;  %v50_v25 = vld [vmem:[%s1224_s0 + $0x118] sm:$0xff]  ;;  %v99_v27 = vpack.c.bf16 %v29_v21, %v19_v20  ;;  %v106_v32 = vpack.c.bf16 %v46_v23, %v36_v22  ;;  %v35_v36 = vld [vmem:[%s1224_s0 + $0xa0] sm:$0xff] }
   0x8   :  { %v148_v28 = vld [vmem:[%s1223_s1 + $0x68] sm:$0x33]  ;;  %v146_v29 = vld [vmem:[%s1223_s1 + $0x58] sm:$0x33]  ;;  %v110_v33 = vpack.c.bf16 %v50_v25, %v40_v24  ;;  %v45_v37 = vld [vmem:[%s1224_s0 + $0xf0] sm:$0xff] }
   0x9   :  { %v786_v30 = vld [vmem:[%s1223_s1 + $0x8] ss:$40 sps:$4 sm:$0xff]   ;;  %v789_v31 = vld [vmem:[%s1223_s1 + $0x18] ss:$40 sps:$4 sm:$0xff]   ;;  %v703_v34 = vcombine.high %v148_v28, %v148_v28  ;;  %v699_v35 = vcombine.high %v146_v29, %v146_v29  ;;  %v105_v44 = vpack.c.bf16 %v45_v37, %v35_v36  ;;  %v702_v46 = vcombine.low %v148_v28, %v148_v28  ;;  %v798_v50 = vld [vmem:[%s1223_s1 + $0x24] ss:$40 sps:$4 sm:$0xff]  }
   0xa   :  { %v39_v38 = vld [vmem:[%s1224_s0 + $0xc0] sm:$0xff]  ;;  %v49_v39 = vld [vmem:[%s1224_s0 + $0x110] sm:$0xff]  ;;  %v56_v40 = vld [vmem:[%s1224_s0 + $0x148] sm:$0xff]  ;;  %v698_v49 = vcombine.low %v146_v29, %v146_v29 }
   0xb   :  { %243 = vmatpush1.bf16.xpose.msra.mxu1 %v696_v14  ;;  %373 = vmatpush1.bf16.xpose.msra.mxu0 %v892_v15  ;;  %v66_v41 = vld [vmem:[%s1224_s0 + $0x198] sm:$0xff]  ;;  %v32_v43 = vld [vmem:[%s1224_s0 + $0x88] sm:$0xff]  ;;  %v109_v45 = vpack.c.bf16 %v49_v39, %v39_v38  ;;  %v55_v51 = vld [vmem:[%s1224_s0 + $0x140] sm:$0xff] }
   0xc   :  { %305 = vmatprep.subr.bf16.mxu1 %v788_v16  ;;  %435 = vmatprep.subr.bf16.mxu0 %v791_v17  ;;  %v22_v42 = vld [vmem:[%s1224_s0 + $0x38] sm:$0xff]  ;;  %v116_v47 = vpack.c.bf16 %v66_v41, %v56_v40  ;;  %v65_v52 = vld [vmem:[%s1224_s0 + $0x190] sm:$0xff]  ;;  %v31_v54 = vld [vmem:[%s1224_s0 + $0x80] sm:$0xff] }
   0xd   :  { %v102_v48 = vpack.c.bf16 %v32_v43, %v22_v42  ;;  %v21_v53 = vld [vmem:[%s1224_s0 + $0x30] sm:$0xff]  ;;  %v76_v55 = vld [vmem:[%s1224_s0 + $0x1e8] sm:$0xff]  ;;  %v86_v56 = vld [vmem:[%s1224_s0 + $0x238] sm:$0xff]  ;;  %v115_v60 = vpack.c.bf16 %v65_v52, %v55_v51 }
   0xe   :  { %v42_v57 = vld [vmem:[%s1224_s0 + $0xd8] sm:$0xff]  ;;  %v52_v58 = vld [vmem:[%s1224_s0 + $0x128] sm:$0xff]  ;;  %v149_v59 = vld [vmem:[%s1223_s1 + $0x70] sm:$0x33]  ;;  %v101_v61 = vpack.c.bf16 %v31_v54, %v21_v53  ;;  %v126_v63 = vpack.c.bf16 %v86_v56, %v76_v55 }
   0xf   :  { %v796_v62 = vld [vmem:[%s1223_s1 + $0x20] ss:$40 sps:$4 sm:$0xff]   ;;  %v112_v0 = vpack.c.bf16 %v52_v58, %v42_v57  ;;  %v705_v2 = vcombine.high %v149_v59, %v149_v59  ;;  %v41_v5 = vld [vmem:[%s1224_s0 + $0xd0] sm:$0xff]  ;;  %v18_v7 = vld [vmem:[%s1224_s0 + $0x18] sm:$0xff]  ;;  %v704_v17 = vcombine.low %v149_v59, %v149_v59 }
  0x10   :  { %v75_v4 = vld [vmem:[%s1224_s0 + $0x1e0] sm:$0xff]  ;;  %v28_v8 = vld [vmem:[%s1224_s0 + $0x68] sm:$0xff]  ;;  %v62_v10 = vld [vmem:[%s1224_s0 + $0x178] sm:$0xff] }
  0x11   :  { %v51_v6 = vld [vmem:[%s1224_s0 + $0x120] sm:$0xff]  ;;  %v72_v11 = vld [vmem:[%s1224_s0 + $0x1c8] sm:$0xff]  ;;  %v98_v14 = vpack.c.bf16 %v28_v8, %v18_v7  ;;  %v17_v18 = vld [vmem:[%s1224_s0 + $0x10] sm:$0xff] }
  0x12   :  { %273 = vmatmul.mubr.bf16.vlgmr.msra.gmra.mrb[0].mxu1 %v95_v26  ;;  %403 = vmatmul.mubr.bf16.vlgmr.msra.gmra.mrb[0].mxu0 %v99_v27  ;;  %v111_v13 = vpack.c.bf16 %v51_v6, %v41_v5  ;;  %v122_v16 = vpack.c.bf16 %v72_v11, %v62_v10  ;;  %v27_v19 = vld [vmem:[%s1224_s0 + $0x60] sm:$0xff]  ;;  %v61_v20 = vld [vmem:[%s1224_s0 + $0x170] sm:$0xff]  ;;  %v38_v22 = vld [vmem:[%s1224_s0 + $0xb8] sm:$0xff] }
  0x13   :  { %306 = vmatpush1.bf16.xpose.msra.mxu1 %v786_v30  ;;  %436 = vmatpush1.bf16.xpose.msra.mxu0 %v789_v31  ;;  %v71_v21 = vld [vmem:[%s1224_s0 + $0x1c0] sm:$0xff]  ;;  %v48_v23 = vld [vmem:[%s1224_s0 + $0x108] sm:$0xff]  ;;  %v82_v24 = vld [vmem:[%s1224_s0 + $0x218] sm:$0xff]  ;;  %v97_v26 = vpack.c.bf16 %v27_v19, %v17_v18 }
  0x14   :  { %280 = vmatprep.mubr.bf16.mxu1 %v106_v32  ;;  %410 = vmatprep.mubr.bf16.mxu0 %v110_v33  ;;  %v92_v25 = vld [vmem:[%s1224_s0 + $0x268] sm:$0xff]  ;;  %v121_v27 = vpack.c.bf16 %v71_v21, %v61_v20  ;;  %v108_v28 = vpack.c.bf16 %v48_v23, %v38_v22  ;;  %v37_v30 = vld [vmem:[%s1224_s0 + $0xb0] sm:$0xff]  ;;  %v47_v31 = vld [vmem:[%s1224_s0 + $0x100] sm:$0xff] }
  0x15   :  { %437 = vmatprep.subr.bf16.mxu0 %v703_v34  ;;  %307 = vmatprep.subr.bf16.mxu1 %v699_v35  ;;  %v132_v29 = vpack.c.bf16 %v92_v25, %v82_v24  ;;  %v81_v32 = vld [vmem:[%s1224_s0 + $0x210] sm:$0xff]  ;;  %v91_v33 = vld [vmem:[%s1224_s0 + $0x260] sm:$0xff]  ;;  %v58_v34 = vld [vmem:[%s1224_s0 + $0x158] sm:$0xff]  ;;  %v107_v37 = vpack.c.bf16 %v47_v31, %v37_v30 }
  0x16   :  { %v68_v35 = vld [vmem:[%s1224_s0 + $0x1a8] sm:$0xff]  ;;  %v34_v36 = vld [vmem:[%s1224_s0 + $0x98] sm:$0xff]  ;;  %v131_v38 = vpack.c.bf16 %v91_v33, %v81_v32  ;;  %v57_v41 = vld [vmem:[%s1224_s0 + $0x150] sm:$0xff] }
  0x17   :  { %v118_v39 = vpack.c.bf16 %v68_v35, %v58_v34  ;;  %v67_v42 = vld [vmem:[%s1224_s0 + $0x1a0] sm:$0xff]  ;;  %v33_v43 = vld [vmem:[%s1224_s0 + $0x90] sm:$0xff]  ;;  %v60_v55 = vld [vmem:[%s1224_s0 + $0x168] sm:$0xff] }
  0x18   :  { %v87_v52 = vld [vmem:[%s1224_s0 + $0x240] sm:$0xff]  ;;  %v53_v54 = vld [vmem:[%s1224_s0 + $0x130] sm:$0xff]  ;;  %v70_v56 = vld [vmem:[%s1224_s0 + $0x1b8] sm:$0xff] }
  0x19   :  { %v43_v53 = vld [vmem:[%s1224_s0 + $0xe0] sm:$0xff]  ;;  %v64_v57 = vld [vmem:[%s1224_s0 + $0x188] sm:$0xff]  ;;  %v74_v58 = vld [vmem:[%s1224_s0 + $0x1d8] sm:$0xff] }
  0x1a   :  { %281 = vmatmul.mubr.bf16.gmra.mrb[4].mxu1 %v105_v44  ;;  %411 = vmatmul.mubr.bf16.gmra.mrb[4].mxu0 %v109_v45  ;;  %v78_v44 = vld [vmem:[%s1224_s0 + $0x1f8] sm:$0xff]  ;;  %v88_v45 = vld [vmem:[%s1224_s0 + $0x248] sm:$0xff] }
  0x1b   :  { %438 = vmatpush1.bf16.xpose.msra.mxu0 %v702_v46  ;;  %288 = vmatprep.mubr.bf16.mxu1 %v116_v47  ;;  %v44_v46 = vld [vmem:[%s1224_s0 + $0xe8] sm:$0xff]  ;;  %v54_v47 = vld [vmem:[%s1224_s0 + $0x138] sm:$0xff] }
  0x1c   :  { %467 = vmatprep.mubr.bf16.mxu0 %v102_v48  ;;  %308 = vmatpush1.bf16.xpose.msra.mxu1 %v698_v49  ;;  %v117_v48 = vpack.c.bf16 %v67_v42, %v57_v41  ;;  %v114_v51 = vpack.c.bf16 %v54_v47, %v44_v46  ;;  %v90_v5 = vld [vmem:[%s1224_s0 + $0x258] sm:$0xff]  ;;  %v84_v6 = vld [vmem:[%s1224_s0 + $0x228] sm:$0xff] }
  0x1d   :  { %500 = vmatprep.subr.bf16.mxu0 %v798_v50  ;;  %708 = vmatprep.subr.bf16.mxu1 %v859_v1  ;;  %v85_v1 = vld [vmem:[%s1224_s0 + $0x230] sm:$0xff]  ;;  %v128_v50 = vpack.c.bf16 %v88_v45, %v78_v44  ;;  %v94_v7 = vld [vmem:[%s1224_s0 + $0x278] sm:$0xff] }
  0x1e   :  { %v125_v12 = vpack.c.bf16 %v85_v1, %v75_v4  ;;  %v73_v4 = vld [vmem:[%s1224_s0 + $0x1d0] sm:$0xff]  ;;  %v80_v1 = vld [vmem:[%s1224_s0 + $0x208] sm:$0xff] }
  0x1f   :  { %v130_v11 = vpack.c.bf16 %v90_v5, %v80_v1 }
  0x22   :  { %289 = vmatmul.mubr.bf16.gmra.mrb[8].mxu1 %v115_v60  ;;  %468 = vmatmul.mubr.bf16.vlgmr.msra.gmra.mrb[0].mxu0 %v101_v61  ;;  %v113_v60 = vpack.c.bf16 %v53_v54, %v43_v53  ;;  %v120_v61 = vpack.c.bf16 %v70_v56, %v60_v55 }
  0x23   :  { %501 = vmatpush1.bf16.xpose.msra.mxu0 %v796_v62  ;;  %296 = vmatprep.mubr.bf16.mxu1 %v126_v63  ;;  %v124_v62 = vpack.c.bf16 %v74_v58, %v64_v57  ;;  %v59_v63 = vld [vmem:[%s1224_s0 + $0x160] sm:$0xff] }
  0x24   :  { %475 = vmatprep.mubr.bf16.mxu0 %v112_v0  ;;  %502 = vmatprep.subr.bf16.mxu0 %v705_v2  ;;  %v69_v0 = vld [vmem:[%s1224_s0 + $0x1b0] sm:$0xff]  ;;  %v63_v2 = vld [vmem:[%s1224_s0 + $0x180] sm:$0xff] }
  0x25   :  { %v119_v8 = vpack.c.bf16 %v69_v0, %v59_v63  ;;  %v123_v10 = vpack.c.bf16 %v73_v4, %v63_v2 }
  0x2a   :  { %297 = vmatmul.mubr.bf16.gmra.mrb[12].mxu1 %v125_v12  ;;  %476 = vmatmul.mubr.bf16.gmra.mrb[4].mxu0 %v111_v13  ;;  %v134_v12 = vpack.c.bf16 %v94_v7, %v84_v6  ;;  %v79_v13 = vld [vmem:[%s1224_s0 + $0x200] sm:$0xff] }
  0x2b   :  { %337 = vmatprep.mubr.bf16.mxu1 %v98_v14  ;;  %483 = vmatprep.mubr.bf16.mxu0 %v122_v16  ;;  %v89_v14 = vld [vmem:[%s1224_s0 + $0x250] sm:$0xff]  ;;  %v83_v16 = vld [vmem:[%s1224_s0 + $0x220] sm:$0xff] }
  0x2c   :  { %503 = vmatpush1.bf16.xpose.msra.mxu0 %v704_v17  ;;  %v93_v17 = vld [vmem:[%s1224_s0 + $0x270] sm:$0xff]  ;;  %v129_v18 = vpack.c.bf16 %v89_v14, %v79_v13 }
  0x2d   :  { %v133_v19 = vpack.c.bf16 %v93_v17, %v83_v16 }
  0x32   :  { %338 = vmatmul.mubr.bf16.vlgmr.msra.gmra.mrb[0].mxu1 %v97_v26  ;;  %484 = vmatmul.mubr.bf16.gmra.mrb[8].mxu0 %v121_v27 }
  0x33   :  { %710 = vmatpush1.bf16.xpose.msra.mxu1 %v867_v3  ;;  %345 = vmatprep.mubr.bf16.mxu1 %v108_v28  ;;  %v24_v3 = vld [vmem:[%s1224_s0 + $0x48] sm:$0xff]  ;;  %v1157_v28 = vld [vmem:[%s1225_s2] ss:$0 sm:$0xff] }
  0x34   :  { %491 = vmatprep.mubr.bf16.mxu0 %v132_v29  ;;  %709 = vmatprep.subr.bf16.mxu1 %v883_v9  ;;  %v104_v40 = vpack.c.bf16 %v34_v36, %v24_v3  ;;  %v23_v9 = vld [vmem:[%s1224_s0 + $0x40] sm:$0xff] }
  0x35   :  { %v103_v49 = vpack.c.bf16 %v33_v43, %v23_v9 }
  0x3a   :  { %346 = vmatmul.mubr.bf16.gmra.mrb[4].mxu1 %v107_v37  ;;  %492 = vmatmul.mubr.bf16.gmra.mrb[12].mxu0 %v131_v38  ;;  %v1164_v37 = vld [vmem:[%s1225_s2 + $0x1] ss:$0 sm:$0xff] }
  0x3b   :  { %353 = vmatprep.mubr.bf16.mxu1 %v118_v39  ;;  %532 = vmatprep.mubr.bf16.mxu0 %v104_v40 }
  0x3c   :  { %711 = vmatpush1.bf16.xpose.msra.mxu1 %v892_v15  ;;  %v77_v15 = vld [vmem:[%s1224_s0 + $0x1f0] sm:$0xff] }
  0x3d   :  { %v127_v59 = vpack.c.bf16 %v87_v52, %v77_v15 }
  0x42   :  { %354 = vmatmul.mubr.bf16.gmra.mrb[8].mxu1 %v117_v48  ;;  %533 = vmatmul.mubr.bf16.vlgmr.msra.gmra.mrb[0].mxu0 %v103_v49 }
  0x43   :  { %361 = vmatprep.mubr.bf16.mxu1 %v128_v50  ;;  %540 = vmatprep.mubr.bf16.mxu0 %v114_v51 }
  0x4a   :  { %362 = vmatmul.mubr.bf16.gmra.mrb[12].mxu1 %v127_v59  ;;  %541 = vmatmul.mubr.bf16.gmra.mrb[4].mxu0 %v113_v60 }
  0x4b   :  { %418 = vmatprep.mubr.bf16.mxu1 %v120_v61  ;;  %548 = vmatprep.mubr.bf16.mxu0 %v124_v62 }
  0x52   :  { %419 = vmatmul.mubr.bf16.vlgmr.msra.gmra.mrb[8].mxu1 %v119_v8  ;;  %549 = vmatmul.mubr.bf16.gmra.mrb[8].mxu0 %v123_v10 }
  0x53   :  { %426 = vmatprep.mubr.bf16.mxu1 %v130_v11  ;;  %556 = vmatprep.mubr.bf16.mxu0 %v134_v12 }
  0x5a   :  { %427 = vmatmul.mubr.bf16.gmra.mrb[12].mxu1 %v129_v18  ;;  %557 = vmatmul.mubr.bf16.gmra.mrb[12].mxu0 %v133_v19 }
 0x105   :  { %v339_v20 = vpop.f32.mrb[0].mxu1 }
 0x106   :  { %v341_v21 = vpop.f32.mrb[1].mxu1  ;;  %v712_v29 = vadd.f32 %v1157_v28, %v339_v20 }
 0x107   :  { %v342_v22 = vpop.f32.mrb[2].mxu1 }
 0x108   :  { %v344_v23 = vpop.f32.mrb[3].mxu1  ;;  %v714_v31 = vadd.f32 %v1157_v28, %v342_v22 }
 0x10d   :  { %v347_v24 = vpop.f32.mrb[4].mxu1 }
 0x10e   :  { %v349_v25 = vpop.f32.mrb[5].mxu1  ;;  %v716_v40 = vadd.f32 %v1157_v28, %v347_v24 }
 0x10f   :  { %v350_v26 = vpop.f32.mrb[6].mxu1 }
 0x110   :  { %v352_v27 = vpop.f32.mrb[7].mxu1  ;;  %v718_v43 = vadd.f32 %v1157_v28, %v350_v26 }
 0x115   :  { %v534_v30 = vpop.f32.mrb[0].mxu0 }
 0x116   :  { %v713_v32 = vadd.f32 %v712_v29, %v534_v30  ;;  %v536_v33 = vpop.f32.mrb[1].mxu0 }
 0x117   :  { %v537_v34 = vpop.f32.mrb[2].mxu0 }
 0x118   :  { %v565_v35 = vmul.f32 0.2, %v713_v32  ;;  %v715_v3 = vadd.f32 %v714_v31, %v537_v34  ;;  %v539_v36 = vpop.f32.mrb[3].mxu0 }
 0x11a   :  { %v573_v38 = vmax.f32 %v713_v32, %v565_v35  ;;  %v566_v39 = vmul.f32 0.2, %v715_v3 }
 0x11c   :  { %v574_v41 = vmax.f32 %v715_v3, %v566_v39  ;;  %v586_v42 = vmul.f32 %v1164_v37, %v573_v38  ;;  %v707_v38 = vld [vmem:[%s1225_s2 + $0x2] ss:$0 sm:$0xff] }
 0x11d   :  { %v542_v9 = vpop.f32.mrb[4].mxu0 }
 0x11e   :  { %v717_v44 = vadd.f32 %v716_v40, %v542_v9  ;;  %v544_v45 = vpop.f32.mrb[5].mxu0  ;;  %v595_v46 = vsel %vm594_vm0, %v586_v42, 0.0  ;;  %v587_v47 = vmul.f32 %v1164_v37, %v574_v41 }
 0x11f   :  { %v545_v48 = vpop.f32.mrb[6].mxu0  ;;  %596 = vadd.xlane.f32.xlu0 %v595_v46 }
 0x120   :  { %v567_v49 = vmul.f32 0.2, %v717_v44  ;;  %v719_v50 = vadd.f32 %v718_v43, %v545_v48  ;;  %v547_v51 = vpop.f32.mrb[7].mxu0  ;;  %v598_v53 = vsel %vm594_vm0, %v587_v47, 0.0 }
 0x122   :  { %v575_v15 = vmax.f32 %v717_v44, %v567_v49  ;;  %v568_v52 = vmul.f32 0.2, %v719_v50 }
 0x123   :  { %599 = vadd.xlane.f32.xlu0 %v598_v53 }
 0x124   :  { %v576_v54 = vmax.f32 %v719_v50, %v568_v52  ;;  %v588_v55 = vmul.f32 %v1164_v37, %v575_v15 }
 0x125   :  { %v420_v56 = vpop.f32.mrb[8].mxu1  ;;  %v550_v57 = vpop.f32.mrb[8].mxu0 }
 0x126   :  { %v720_v58 = vadd.f32 %v1157_v28, %v420_v56  ;;  %v422_v59 = vpop.f32.mrb[9].mxu1  ;;  %v552_v60 = vpop.f32.mrb[9].mxu0  ;;  %v601_v61 = vsel %vm594_vm0, %v588_v55, 0.0  ;;  %v589_v62 = vmul.f32 %v1164_v37, %v576_v54 }
 0x127   :  { %v553_v63 = vpop.f32.mrb[10].mxu0  ;;  %602 = vadd.xlane.f32.xlu1 %v601_v61  ;;  %v423_v0 = vpop.f32.mrb[10].mxu1 }
 0x128   :  { %v721_v2 = vadd.f32 %v720_v58, %v550_v57  ;;  %v722_v4 = vadd.f32 %v1157_v28, %v423_v0  ;;  %v425_v1 = vpop.f32.mrb[11].mxu1  ;;  %v555_v5 = vpop.f32.mrb[11].mxu0  ;;  %v604_v8 = vsel %vm594_vm0, %v589_v62, 0.0 }
 0x12a   :  { %v569_v6 = vmul.f32 0.2, %v721_v2  ;;  %v723_v7 = vadd.f32 %v722_v4, %v553_v63 }
 0x12b   :  { %605 = vadd.xlane.f32.xlu1 %v604_v8 }
 0x12c   :  { %v577_v10 = vmax.f32 %v721_v2, %v569_v6  ;;  %v570_v11 = vmul.f32 0.2, %v723_v7 }
 0x12d   :  { %v428_v12 = vpop.f32.mrb[12].mxu1  ;;  %v558_v13 = vpop.f32.mrb[12].mxu0 }
 0x12e   :  { %v724_v14 = vadd.f32 %v1157_v28, %v428_v12  ;;  %v430_v16 = vpop.f32.mrb[13].mxu1  ;;  %v560_v17 = vpop.f32.mrb[13].mxu0  ;;  %v590_v18 = vmul.f32 %v1164_v37, %v577_v10  ;;  %v578_v19 = vmax.f32 %v723_v7, %v570_v11 }
 0x12f   :  { %v431_v20 = vpop.f32.mrb[14].mxu1  ;;  %v561_v21 = vpop.f32.mrb[14].mxu0 }
 0x130   :  { %v725_v22 = vadd.f32 %v724_v14, %v558_v13  ;;  %v726_v23 = vadd.f32 %v1157_v28, %v431_v20  ;;  %v433_v24 = vpop.f32.mrb[15].mxu1  ;;  %v563_v25 = vpop.f32.mrb[15].mxu0  ;;  %v607_v26 = vsel %vm594_vm0, %v590_v18, 0.0  ;;  %v591_v27 = vmul.f32 %v1164_v37, %v578_v19 }
 0x131   :  { %608 = vadd.xlane.f32.xlu0 %v607_v26 }
 0x132   :  { %v571_v29 = vmul.f32 0.2, %v725_v22  ;;  %v727_v30 = vadd.f32 %v726_v23, %v561_v21  ;;  %v610_v31 = vsel %vm594_vm0, %v591_v27, 0.0 }
 0x133   :  { %611 = vadd.xlane.f32.xlu1 %v610_v31 }
 0x134   :  { %v579_v32 = vmax.f32 %v725_v22, %v571_v29  ;;  %v572_v33 = vmul.f32 0.2, %v727_v30 }
 0x136   :  { %v580_v34 = vmax.f32 %v727_v30, %v572_v33  ;;  %v592_v35 = vmul.f32 %v1164_v37, %v579_v32 }
 0x138   :  { %v613_v3 = vsel %vm594_vm0, %v592_v35, 0.0  ;;  %v593_v28 = vmul.f32 %v1164_v37, %v580_v34 }
 0x139   :  { %614 = vadd.xlane.f32.xlu0 %v613_v3 }
 0x13a   :  { %v616_v36 = vsel %vm594_vm0, %v593_v28, 0.0 }
 0x13b   :  { %617 = vadd.xlane.f32.xlu1 %v616_v36 }
 0x1ac   :  { %v597_v39 = vpop.xlane.xlu0 %596 }
 0x1ad   :  { %v624_v40 = vadd.f32 %v707_v38, %v597_v39 }
 0x1af   :  { %v632_v41 = vsub.f32 0.0, %v624_v40 }
 0x1b0   :  { %v600_v42 = vpop.xlane.xlu0 %599 }
 0x1b1   :  { %v640_v9 = vmul.f32 1.442695, %v632_v41  ;;  %v625_v43 = vadd.f32 %v707_v38, %v600_v42 }
 0x1b3   :  { %801 = vpow2.f32 %v640_v9  ;;  %v633_v44 = vsub.f32 0.0, %v625_v43 }
 0x1b4   :  { %v603_v45 = vpop.xlane.xlu1 %602 }
 0x1b5   :  { %v642_v46 = vmul.f32 1.442695, %v633_v44  ;;  %v626_v47 = vadd.f32 %v707_v38, %v603_v45 }
 0x1b7   :  { %803 = vpow2.f32 %v642_v46  ;;  %v634_v37 = vsub.f32 0.0, %v626_v47 }
 0x1b8   :  { %v606_v48 = vpop.xlane.xlu1 %605 }
 0x1b9   :  { %v644_v49 = vmul.f32 1.442695, %v634_v37  ;;  %v627_v50 = vadd.f32 %v707_v38, %v606_v48 }
 0x1bb   :  { %805 = vpow2.f32 %v644_v49  ;;  %v635_v51 = vsub.f32 0.0, %v627_v50 }
 0x1bd   :  { %v802_v15 = vpop.eup %801  ;;  %v646_v52 = vmul.f32 1.442695, %v635_v51 }
 0x1be   :  { %v656_v53 = vadd.f32 1.0, %v802_v15  ;;  %v609_v54 = vpop.xlane.xlu0 %608 }
 0x1bf   :  { %807 = vpow2.f32 %v646_v52  ;;  %v628_v55 = vadd.f32 %v707_v38, %v609_v54 }
 0x1c0   :  { %809 = vrcp.f32 %v656_v53  ;;  %v612_v56 = vpop.xlane.xlu1 %611 }
 0x1c1   :  { %v804_v57 = vpop.eup %803  ;;  %v636_v58 = vsub.f32 0.0, %v628_v55  ;;  %v629_v59 = vadd.f32 %v707_v38, %v612_v56 }
 0x1c2   :  { %v657_v60 = vadd.f32 1.0, %v804_v57 }
 0x1c3   :  { %v648_v61 = vmul.f32 1.442695, %v636_v58  ;;  %v637_v62 = vsub.f32 0.0, %v629_v59 }
 0x1c4   :  { %811 = vrcp.f32 %v657_v60 }
 0x1c5   :  { %v806_v63 = vpop.eup %805  ;;  %813 = vpow2.f32 %v648_v61  ;;  %v650_v0 = vmul.f32 1.442695, %v637_v62 }
 0x1c6   :  { %v658_v2 = vadd.f32 1.0, %v806_v63  ;;  %v615_v4 = vpop.xlane.xlu0 %614 }
 0x1c7   :  { %815 = vpow2.f32 %v650_v0  ;;  %v630_v1 = vadd.f32 %v707_v38, %v615_v4 }
 0x1c8   :  { %817 = vrcp.f32 %v658_v2  ;;  %v618_v5 = vpop.xlane.xlu1 %617 }
 0x1c9   :  { %v808_v6 = vpop.eup %807  ;;  %v638_v7 = vsub.f32 0.0, %v630_v1  ;;  %v631_v8 = vadd.f32 %v707_v38, %v618_v5 }
 0x1ca   :  { %v810_v10 = vpop.eup %809  ;;  %v659_v11 = vadd.f32 1.0, %v808_v6 }
 0x1cb   :  { %673 = vst.msk [vmem:[%s1226_s3] sm:$0xff] %vm672_vm1, %v810_v10  ;;  %v652_v12 = vmul.f32 1.442695, %v638_v7  ;;  %v639_v13 = vsub.f32 0.0, %v631_v8 }
 0x1cc   :  { %819 = vrcp.f32 %v659_v11 }
 0x1cd   :  { %821 = vpow2.f32 %v652_v12  ;;  %v654_v14 = vmul.f32 1.442695, %v639_v13 }
 0x1ce   :  { %v812_v16 = vpop.eup %811 }
 0x1cf   :  { %v814_v17 = vpop.eup %813  ;;  %674 = vst.msk [vmem:[%s1226_s3 + $0x8] sm:$0xff] %vm672_vm1, %v812_v16  ;;  %823 = vpow2.f32 %v654_v14 }
 0x1d0   :  { %v660_v18 = vadd.f32 1.0, %v814_v17 }
 0x1d1   :  { %v816_v19 = vpop.eup %815 }
 0x1d2   :  { %v818_v20 = vpop.eup %817  ;;  %825 = vrcp.f32 %v660_v18  ;;  %v661_v21 = vadd.f32 1.0, %v816_v19 }
 0x1d3   :  { %675 = vst.msk [vmem:[%s1226_s3 + $0x10] sm:$0xff] %vm672_vm1, %v818_v20 }
 0x1d4   :  { %827 = vrcp.f32 %v661_v21 }
 0x1d6   :  { %v820_v22 = vpop.eup %819 }
 0x1d7   :  { %v822_v23 = vpop.eup %821  ;;  %676 = vst.msk [vmem:[%s1226_s3 + $0x18] sm:$0xff] %vm672_vm1, %v820_v22 }
 0x1d8   :  { %v662_v24 = vadd.f32 1.0, %v822_v23 }
 0x1d9   :  { %v824_v25 = vpop.eup %823 }
 0x1da   :  { %829 = vrcp.f32 %v662_v24  ;;  %v663_v26 = vadd.f32 1.0, %v824_v25 }
 0x1dc   :  { %v826_v27 = vpop.eup %825  ;;  %831 = vrcp.f32 %v663_v26 }
 0x1dd   :  { %677 = vst.msk [vmem:[%s1226_s3 + $0x20] sm:$0xff] %vm672_vm1, %v826_v27 }
 0x1de   :  { %v828_v29 = vpop.eup %827 }
 0x1df   :  { %678 = vst.msk [vmem:[%s1226_s3 + $0x28] sm:$0xff] %vm672_vm1, %v828_v29 }
 0x1e4   :  { %v830_v30 = vpop.eup %829 }
 0x1e5   :  { %679 = vst.msk [vmem:[%s1226_s3 + $0x30] sm:$0xff] %vm672_vm1, %v830_v30 }
 0x1e6   :  { %v832_v31 = vpop.eup %831 }
 0x1e7   :  { %680 = vst.msk [vmem:[%s1226_s3 + $0x38] sm:$0xff] %vm672_vm1, %v832_v31 }

</bundles_post_ra>
